<compile_context>
chip_gen: v6e
topology: v6e:2x2x1
jax: 0.10.0
libtpu: 0.0.40
codegen_flags: <defaults>
</compile_context>

<pallas_src>
import functools

import jax
import jax.numpy as jnp
from jax.experimental import pallas as pl
from jax.experimental.pallas import tpu as pltpu


def _interaction_kernel(TILE_N, M, N, matmul_dtype,
                        feat_ref, rbf_ref, nbr_ref,
                        w_init_ref,
                        w_f1_ref, b_f1_ref, w_f2_ref, b_f2_ref,
                        w_o1_ref, b_o1_ref, w_o2_ref, b_o2_ref,
                        out_ref, attn_ref, conv_ref):
    f32 = jnp.float32
    md = matmul_dtype
    TILE_NM = TILE_N * M

    # 1) initial_dense (Linear, bias=False, no activation) over the *full* batch
    #    element: these rows are the gather source, so all N nodes are needed.
    #    (Recomputed per node tile; negligible vs. the per-edge matmuls below.)
    init = jnp.dot(feat_ref[...].astype(md), w_init_ref[...].astype(md),
                   preferred_element_type=f32)                          # (N, F)

    # 2) cfconv filter generator: Linear + tanh, then Linear (edges of this tile)
    h = jnp.tanh(jnp.dot(rbf_ref[...].astype(md), w_f1_ref[...].astype(md),
                         preferred_element_type=f32) + b_f1_ref[...])
    filt = jnp.dot(h.astype(md), w_f2_ref[...].astype(md),
                   preferred_element_type=f32) + b_f2_ref[...]          # (TILE_NM, F)
    attn_ref[...] = filt.astype(attn_ref.dtype)

    # 3) neighbor gather as a per-batch one-hot matmul of width N (MXU-friendly).
    #    Any out-of-range (padded) index contributes zero.
    idx = nbr_ref[...]                                                   # (TILE_NM, 1) int32
    cols = jax.lax.broadcasted_iota(jnp.int32, (TILE_NM, N), 1)
    onehot = (idx == cols).astype(md)                                    # (TILE_NM, N)
    nbr_feat = jnp.dot(onehot, init.astype(md),
                       preferred_element_type=f32)                       # (TILE_NM, F)

    # 4) continuous-filter conv + sum over the M neighbors of each node.
    #    Rows are node-major / neighbor-minor, so neighbor slot m of every node
    #    sits at rows m, m+M, m+2M, ... -> M sublane-strided reads of a scratch.
    conv_ref[...] = nbr_feat * filt                                      # (TILE_NM, F)
    agg = conv_ref[pl.ds(0, TILE_N, stride=M), :]
    for m in range(1, M):                                                # M is small & static
        agg = agg + conv_ref[pl.ds(m, TILE_N, stride=M), :]              # (TILE_N, F)

    # 5) output_dense: Linear + tanh, then Linear
    h2 = jnp.tanh(jnp.dot(agg.astype(md), w_o1_ref[...].astype(md),
                          preferred_element_type=f32) + b_o1_ref[...])
    out = jnp.dot(h2.astype(md), w_o2_ref[...].astype(md),
                  preferred_element_type=f32) + b_o2_ref[...]            # (TILE_N, F)
    out_ref[...] = out.astype(out_ref.dtype)


def _pick_tile_n(N, M, G, F, budget_bytes=8 * 1024 * 1024):
    """Largest node tile that divides N, keeps the (8,128) sublane rule when
    tiled, and keeps the double-buffered per-tile blocks under budget_bytes."""
    def tile_bytes(t):
        # rbf + attn + nbr blocks (double-buffered) + conv scratch + out block
        return 4 * (2 * t * M * (G + F + 1) + t * M * F + 2 * t * F)

    valid = [t for t in range(N, 0, -1)
             if N % t == 0 and (t == N or t % 8 == 0)]
    for t in valid:
        if tile_bytes(t) <= budget_bytes:
            return t
    return valid[-1]


def classic_interaction_block(features, rbf_expansion, neighbor_list, params,
                              *, tile_n=None, matmul_dtype=jnp.float32):
    """features: (B, N, n_inputs) f32
       rbf_expansion: (B, N, M, n_gaussians) f32
       neighbor_list: (B, N, M) int (bead indices within each batch element)
       Returns (output_features (B, N, F), attn (B, N, M, F))."""
    B, N, n_in = features.shape
    _, _, M, G = rbf_expansion.shape
    F = params["w_init"].shape[1]

    TILE_N = tile_n if tile_n is not None else _pick_tile_n(N, M, G, F)
    assert N % TILE_N == 0 and (TILE_N == N or TILE_N % 8 == 0)
    TILE_NM = TILE_N * M
    num_tiles = N // TILE_N

    feat = features.astype(jnp.float32)
    rbf = rbf_expansion.astype(jnp.float32).reshape(B, N * M, G)
    # Per-batch node indices, kept (..., 1)-shaped for the broadcast compare in
    # the one-hot gather (tiny tensor, so the narrow last dim is negligible).
    nbr = neighbor_list.astype(jnp.int32).reshape(B, N * M, 1)

    kernel = functools.partial(_interaction_kernel, TILE_N, M, N, matmul_dtype)

    def _resident(shape):   # weights/biases: constant block index -> stay in VMEM
        return pl.BlockSpec(shape, lambda b, t: (0, 0))

    in_specs = [
        pl.BlockSpec((None, N, n_in), lambda b, t: (b, 0, 0)),       # full-element features
        pl.BlockSpec((None, TILE_NM, G), lambda b, t: (b, t, 0)),    # this tile's rbf edges
        pl.BlockSpec((None, TILE_NM, 1), lambda b, t: (b, t, 0)),    # this tile's neighbor ids
        _resident((n_in, F)),
        _resident((G, F)), _resident((1, F)),
        _resident((F, F)), _resident((1, F)),
        _resident((F, F)), _resident((1, F)),
        _resident((F, F)), _resident((1, F)),
    ]
    out_specs = (
        pl.BlockSpec((None, TILE_N, F), lambda b, t: (b, t, 0)),
        pl.BlockSpec((None, TILE_NM, F), lambda b, t: (b, t, 0)),
    )

    flops = int(2 * B * num_tiles * N * n_in * F            # initial dense (per tile)
                + 2 * B * N * M * F * (G + F + N)            # filter net + gather
                + 4 * B * N * F * F)                         # output dense
    bytes_accessed = int(4 * (B * N * n_in + B * N * M * (G + 1)
                              + n_in * F + G * F + 3 * F * F + 4 * F
                              + B * N * F + B * N * M * F))
    cost = pl.CostEstimate(flops=flops,
                           transcendentals=int(B * N * F * (M + 1)),
                           bytes_accessed=bytes_accessed)

    tile_vmem = 4 * (2 * TILE_NM * (G + F + 1) + TILE_NM * F
                     + 2 * TILE_N * F + N * n_in
                     + n_in * F + G * F + 3 * F * F + 4 * F)
    vmem_limit = int(min(64 * 2**20, max(32 * 2**20, 2 * tile_vmem)))

    out, attn = pl.pallas_call(
        kernel,
        grid=(B, num_tiles),
        in_specs=in_specs,
        out_specs=out_specs,
        out_shape=(jax.ShapeDtypeStruct((B, N, F), jnp.float32),
                   jax.ShapeDtypeStruct((B, N * M, F), jnp.float32)),
        scratch_shapes=[pltpu.VMEM((TILE_NM, F), jnp.float32)],
        compiler_params=pltpu.CompilerParams(
            dimension_semantics=("parallel", "parallel"),
            vmem_limit_bytes=vmem_limit),
        cost_estimate=cost,
    )(feat, rbf, nbr,
      params["w_init"],
      params["w_f1"], params["b_f1"], params["w_f2"], params["b_f2"],
      params["w_o1"], params["b_o1"], params["w_o2"], params["b_o2"])

    return out, attn.reshape(B, N, M, F)


def reference(features, rbf, nbr, p):
    """Pure-JAX reference mirroring the PyTorch forward."""
    B = features.shape[0]
    init = features @ p["w_init"]                                        # (B, N, F)
    h = jnp.tanh(rbf @ p["w_f1"] + p["b_f1"][0])
    filt = h @ p["w_f2"] + p["b_f2"][0]                                  # (B, N, M, F)
    nbr_feat = init[jnp.arange(B)[:, None, None], nbr]                   # (B, N, M, F)
    agg = jnp.sum(nbr_feat * filt, axis=2)                               # (B, N, F)
    out = jnp.tanh(agg @ p["w_o1"] + p["b_o1"][0]) @ p["w_o2"] + p["b_o2"][0]
    return out, filt


def init_params(key, n_inputs, n_gaussians, n_filters):
    ks = jax.random.split(key, 9)

    def lin(k, fan_in, shape):
        bound = 1.0 / jnp.sqrt(fan_in)
        return jax.random.uniform(k, shape, jnp.float32, -bound, bound)

    F, G = n_filters, n_gaussians
    return {
        "w_init": lin(ks[0], n_inputs, (n_inputs, F)),
        "w_f1": lin(ks[1], G, (G, F)),
        "b_f1": lin(ks[2], G, (1, F)),
        "w_f2": lin(ks[3], F, (F, F)),
        "b_f2": lin(ks[4], F, (1, F)),
        "w_o1": lin(ks[5], F, (F, F)),
        "b_o1": lin(ks[6], F, (1, F)),
        "w_o2": lin(ks[7], F, (F, F)),
        "b_o2": lin(ks[8], F, (1, F)),
    }


if __name__ == "__main__":
    B, N, M = 2, 8, 4                                 # batch, beads, neighbors per bead
    n_inputs, n_gaussians, n_filters = 32, 64, 128    # F=128 -> lane-dense output stores

    key = jax.random.PRNGKey(0)
    k_feat, k_rbf, k_nbr, k_par = jax.random.split(key, 4)

    features = jax.random.normal(k_feat, (B, N, n_inputs), jnp.float32)
    rbf = jax.random.normal(k_rbf, (B, N, M, n_gaussians), jnp.float32)
    neighbor_list = jax.random.randint(k_nbr, (B, N, M), 0, N, jnp.int32)
    params = init_params(k_par, n_inputs, n_gaussians, n_filters)

    out, attn = classic_interaction_block(features, rbf, neighbor_list, params)
    jax.block_until_ready((out, attn))

    out_ref, attn_ref = reference(features, rbf, neighbor_list, params)
    assert jnp.allclose(out, out_ref, atol=1e-3, rtol=1e-3), \
        float(jnp.max(jnp.abs(out - out_ref)))
    assert jnp.allclose(attn, attn_ref, atol=1e-3, rtol=1e-3), \
        float(jnp.max(jnp.abs(attn - attn_ref)))

    print("KERNEL_OK")
</pallas_src>

<mosaic_0001>
module attributes {stable_mosaic.version = 11 : i64} {
  func.func @_interaction_kernel(%arg0: i32, %arg1: i32, %arg2: memref<1x8x32xf32, #tpu.memory_space<vmem>>, %arg3: memref<1x32x64xf32, #tpu.memory_space<vmem>>, %arg4: memref<1x32x1xi32, #tpu.memory_space<vmem>>, %arg5: memref<32x128xf32, #tpu.memory_space<vmem>>, %arg6: memref<64x128xf32, #tpu.memory_space<vmem>>, %arg7: memref<1x128xf32, #tpu.memory_space<vmem>>, %arg8: memref<128x128xf32, #tpu.memory_space<vmem>>, %arg9: memref<1x128xf32, #tpu.memory_space<vmem>>, %arg10: memref<128x128xf32, #tpu.memory_space<vmem>>, %arg11: memref<1x128xf32, #tpu.memory_space<vmem>>, %arg12: memref<128x128xf32, #tpu.memory_space<vmem>>, %arg13: memref<1x128xf32, #tpu.memory_space<vmem>>, %arg14: memref<1x8x128xf32, #tpu.memory_space<vmem>>, %arg15: memref<1x32x128xf32, #tpu.memory_space<vmem>>, %arg16: memref<32x128xf32, #tpu.memory_space<vmem>>) attributes {dimension_semantics = [#tpu.dimension_semantics<parallel>, #tpu.dimension_semantics<parallel>], iteration_bounds = array<i64: 2, 1>, scalar_prefetch = 0 : i64, scratch_operands = 1 : i64, tpu.core_type = #tpu.core_type<tc>, window_params = [{transform_indices = @transform_0, window_bounds = array<i64: 1, 8, 32>}, {transform_indices = @transform_1, window_bounds = array<i64: 1, 32, 64>}, {transform_indices = @transform_2, window_bounds = array<i64: 1, 32, 1>}, {pipeline_mode = #tpu.pipeline_mode<synchronous>, transform_indices = @transform_3, window_bounds = array<i64: 32, 128>}, {pipeline_mode = #tpu.pipeline_mode<synchronous>, transform_indices = @transform_4, window_bounds = array<i64: 64, 128>}, {pipeline_mode = #tpu.pipeline_mode<synchronous>, transform_indices = @transform_5, window_bounds = array<i64: 1, 128>}, {pipeline_mode = #tpu.pipeline_mode<synchronous>, transform_indices = @transform_6, window_bounds = array<i64: 128, 128>}, {pipeline_mode = #tpu.pipeline_mode<synchronous>, transform_indices = @transform_7, window_bounds = array<i64: 1, 128>}, {pipeline_mode = #tpu.pipeline_mode<synchronous>, transform_indices = @transform_8, window_bounds = array<i64: 128, 128>}, {pipeline_mode = #tpu.pipeline_mode<synchronous>, transform_indices = @transform_9, window_bounds = array<i64: 1, 128>}, {pipeline_mode = #tpu.pipeline_mode<synchronous>, transform_indices = @transform_10, window_bounds = array<i64: 128, 128>}, {pipeline_mode = #tpu.pipeline_mode<synchronous>, transform_indices = @transform_11, window_bounds = array<i64: 1, 128>}, {transform_indices = @transform_12, window_bounds = array<i64: 1, 8, 128>}, {transform_indices = @transform_13, window_bounds = array<i64: 1, 32, 128>}]} {
    %c0 = arith.constant 0 : index
    %c0_0 = arith.constant 0 : index
    %c0_1 = arith.constant 0 : index
    %0 = vector.load %arg2[%c0, %c0_0, %c0_1] : memref<1x8x32xf32, #tpu.memory_space<vmem>>, vector<1x8x32xf32>
    %1 = vector.shape_cast %0 : vector<1x8x32xf32> to vector<8x32xf32>
    %c0_2 = arith.constant 0 : index
    %c0_3 = arith.constant 0 : index
    %2 = vector.load %arg5[%c0_2, %c0_3] : memref<32x128xf32, #tpu.memory_space<vmem>>, vector<32x128xf32>
    %cst = arith.constant dense<0.000000e+00> : vector<8x128xf32>
    %3 = tpu.matmul %1, %2, %cst {dimension_numbers = #tpu.dot_dimension_numbers<[1], [0], [0], [1], [0, 0, 1, 1], [], []>} : vector<8x32xf32>, vector<32x128xf32>, vector<8x128xf32> -> vector<8x128xf32>
    %c0_4 = arith.constant 0 : index
    %c0_5 = arith.constant 0 : index
    %c0_6 = arith.constant 0 : index
    %4 = vector.load %arg3[%c0_4, %c0_5, %c0_6] : memref<1x32x64xf32, #tpu.memory_space<vmem>>, vector<1x32x64xf32>
    %5 = vector.shape_cast %4 : vector<1x32x64xf32> to vector<32x64xf32>
    %c0_7 = arith.constant 0 : index
    %c0_8 = arith.constant 0 : index
    %6 = vector.load %arg6[%c0_7, %c0_8] : memref<64x128xf32, #tpu.memory_space<vmem>>, vector<64x128xf32>
    %cst_9 = arith.constant dense<0.000000e+00> : vector<32x128xf32>
    %7 = tpu.matmul %5, %6, %cst_9 {dimension_numbers = #tpu.dot_dimension_numbers<[1], [0], [0], [1], [0, 0, 1, 1], [], []>} : vector<32x64xf32>, vector<64x128xf32>, vector<32x128xf32> -> vector<32x128xf32>
    %c0_10 = arith.constant 0 : index
    %c0_11 = arith.constant 0 : index
    %8 = vector.load %arg7[%c0_10, %c0_11] : memref<1x128xf32, #tpu.memory_space<vmem>>, vector<1x128xf32>
    %9 = vector.broadcast %8 : vector<1x128xf32> to vector<32x128xf32>
    %10 = arith.addf %7, %9 : vector<32x128xf32>
    %11 = math.tanh %10 : vector<32x128xf32>
    %c0_12 = arith.constant 0 : index
    %c0_13 = arith.constant 0 : index
    %12 = vector.load %arg8[%c0_12, %c0_13] : memref<128x128xf32, #tpu.memory_space<vmem>>, vector<128x128xf32>
    %cst_14 = arith.constant dense<0.000000e+00> : vector<32x128xf32>
    %13 = tpu.matmul %11, %12, %cst_14 {dimension_numbers = #tpu.dot_dimension_numbers<[1], [0], [0], [1], [0, 0, 1, 1], [], []>} : vector<32x128xf32>, vector<128x128xf32>, vector<32x128xf32> -> vector<32x128xf32>
    %c0_15 = arith.constant 0 : index
    %c0_16 = arith.constant 0 : index
    %14 = vector.load %arg9[%c0_15, %c0_16] : memref<1x128xf32, #tpu.memory_space<vmem>>, vector<1x128xf32>
    %15 = vector.broadcast %14 : vector<1x128xf32> to vector<32x128xf32>
    %16 = arith.addf %13, %15 : vector<32x128xf32>
    %c0_17 = arith.constant 0 : index
    %c0_18 = arith.constant 0 : index
    %c0_19 = arith.constant 0 : index
    %17 = vector.load %arg15[%c0_17, %c0_18, %c0_19] : memref<1x32x128xf32, #tpu.memory_space<vmem>>, vector<1x32x128xf32>
    %18 = vector.shape_cast %17 : vector<1x32x128xf32> to vector<32x128xf32>
    %19 = vector.shape_cast %16 : vector<32x128xf32> to vector<1x32x128xf32>
    tpu.vector_store %arg15[%c0_17, %c0_18, %c0_19], %19 {strides = array<i32>} : memref<1x32x128xf32, #tpu.memory_space<vmem>>, vector<1x32x128xf32>,
    %c0_20 = arith.constant 0 : index
    %c0_21 = arith.constant 0 : index
    %c0_22 = arith.constant 0 : index
    %20 = vector.load %arg4[%c0_20, %c0_21, %c0_22] : memref<1x32x1xi32, #tpu.memory_space<vmem>>, vector<1x32x1xi32>
    %21 = vector.shape_cast %20 : vector<1x32x1xi32> to vector<32x1xi32>
    %22 = tpu.iota {dimensions = array<i32: 1>} : vector<32x8xi32>
    %23 = vector.broadcast %21 : vector<32x1xi32> to vector<32x8xi32>
    %24 = arith.cmpi eq, %23, %22 : vector<32x8xi32>
    %25 = arith.extui %24 : vector<32x8xi1> to vector<32x8xi32>
    %26 = arith.sitofp %25 : vector<32x8xi32> to vector<32x8xf32>
    %cst_23 = arith.constant dense<0.000000e+00> : vector<32x128xf32>
    %27 = tpu.matmul %26, %3, %cst_23 {dimension_numbers = #tpu.dot_dimension_numbers<[1], [0], [0], [1], [0, 0, 1, 1], [], []>} : vector<32x8xf32>, vector<8x128xf32>, vector<32x128xf32> -> vector<32x128xf32>
    %28 = arith.mulf %27, %16 : vector<32x128xf32>
    %c0_24 = arith.constant 0 : index
    %c0_25 = arith.constant 0 : index
    %29 = vector.load %arg16[%c0_24, %c0_25] : memref<32x128xf32, #tpu.memory_space<vmem>>, vector<32x128xf32>
    tpu.vector_store %arg16[%c0_24, %c0_25], %28 {strides = array<i32>} : memref<32x128xf32, #tpu.memory_space<vmem>>, vector<32x128xf32>,
    %c0_26 = arith.constant 0 : index
    %c0_27 = arith.constant 0 : index
    %30 = tpu.strided_load %arg16[%c0_26, %c0_27] {strides = array<i32: 4, 1>} : memref<32x128xf32, #tpu.memory_space<vmem>>, vector<8x128xf32>
    %c1 = arith.constant 1 : index
    %c0_28 = arith.constant 0 : index
    %31 = tpu.strided_load %arg16[%c1, %c0_28] {strides = array<i32: 4, 1>} : memref<32x128xf32, #tpu.memory_space<vmem>>, vector<8x128xf32>
    %32 = arith.addf %30, %31 : vector<8x128xf32>
    %c2 = arith.constant 2 : index
    %c0_29 = arith.constant 0 : index
    %33 = tpu.strided_load %arg16[%c2, %c0_29] {strides = array<i32: 4, 1>} : memref<32x128xf32, #tpu.memory_space<vmem>>, vector<8x128xf32>
    %34 = arith.addf %32, %33 : vector<8x128xf32>
    %c3 = arith.constant 3 : index
    %c0_30 = arith.constant 0 : index
    %35 = tpu.strided_load %arg16[%c3, %c0_30] {strides = array<i32: 4, 1>} : memref<32x128xf32, #tpu.memory_space<vmem>>, vector<8x128xf32>
    %36 = arith.addf %34, %35 : vector<8x128xf32>
    %c0_31 = arith.constant 0 : index
    %c0_32 = arith.constant 0 : index
    %37 = vector.load %arg10[%c0_31, %c0_32] : memref<128x128xf32, #tpu.memory_space<vmem>>, vector<128x128xf32>
    %cst_33 = arith.constant dense<0.000000e+00> : vector<8x128xf32>
    %38 = tpu.matmul %36, %37, %cst_33 {dimension_numbers = #tpu.dot_dimension_numbers<[1], [0], [0], [1], [0, 0, 1, 1], [], []>} : vector<8x128xf32>, vector<128x128xf32>, vector<8x128xf32> -> vector<8x128xf32>
    %c0_34 = arith.constant 0 : index
    %c0_35 = arith.constant 0 : index
    %39 = vector.load %arg11[%c0_34, %c0_35] : memref<1x128xf32, #tpu.memory_space<vmem>>, vector<1x128xf32>
    %40 = vector.broadcast %39 : vector<1x128xf32> to vector<8x128xf32>
    %41 = arith.addf %38, %40 : vector<8x128xf32>
    %42 = math.tanh %41 : vector<8x128xf32>
    %c0_36 = arith.constant 0 : index
    %c0_37 = arith.constant 0 : index
    %43 = vector.load %arg12[%c0_36, %c0_37] : memref<128x128xf32, #tpu.memory_space<vmem>>, vector<128x128xf32>
    %cst_38 = arith.constant dense<0.000000e+00> : vector<8x128xf32>
    %44 = tpu.matmul %42, %43, %cst_38 {dimension_numbers = #tpu.dot_dimension_numbers<[1], [0], [0], [1], [0, 0, 1, 1], [], []>} : vector<8x128xf32>, vector<128x128xf32>, vector<8x128xf32> -> vector<8x128xf32>
    %c0_39 = arith.constant 0 : index
    %c0_40 = arith.constant 0 : index
    %45 = vector.load %arg13[%c0_39, %c0_40] : memref<1x128xf32, #tpu.memory_space<vmem>>, vector<1x128xf32>
    %46 = vector.broadcast %45 : vector<1x128xf32> to vector<8x128xf32>
    %47 = arith.addf %44, %46 : vector<8x128xf32>
    %c0_41 = arith.constant 0 : index
    %c0_42 = arith.constant 0 : index
    %c0_43 = arith.constant 0 : index
    %48 = vector.load %arg14[%c0_41, %c0_42, %c0_43] : memref<1x8x128xf32, #tpu.memory_space<vmem>>, vector<1x8x128xf32>
    %49 = vector.shape_cast %48 : vector<1x8x128xf32> to vector<8x128xf32>
    %50 = vector.shape_cast %47 : vector<8x128xf32> to vector<1x8x128xf32>
    tpu.vector_store %arg14[%c0_41, %c0_42, %c0_43], %50 {strides = array<i32>} : memref<1x8x128xf32, #tpu.memory_space<vmem>>, vector<1x8x128xf32>,
    return
  }
  func.func @transform_0(%arg0: i32, %arg1: i32) -> (i32, i32, i32) {
    %c0_i32 = arith.constant 0 : i32
    %c0_i32_0 = arith.constant 0 : i32
    %c0_i32_1 = arith.constant 0 : i32
    return %arg0, %c0_i32, %c0_i32_0 : i32, i32, i32
  }
  func.func @transform_1(%arg0: i32, %arg1: i32) -> (i32, i32, i32) {
    %c0_i32 = arith.constant 0 : i32
    %c0_i32_0 = arith.constant 0 : i32
    return %arg0, %arg1, %c0_i32 : i32, i32, i32
  }
  func.func @transform_2(%arg0: i32, %arg1: i32) -> (i32, i32, i32) {
    %c0_i32 = arith.constant 0 : i32
    %c0_i32_0 = arith.constant 0 : i32
    return %arg0, %arg1, %c0_i32 : i32, i32, i32
  }
  func.func @transform_3(%arg0: i32, %arg1: i32) -> (i32, i32) {
    %c0_i32 = arith.constant 0 : i32
    %c0_i32_0 = arith.constant 0 : i32
    %c0_i32_1 = arith.constant 0 : i32
    return %c0_i32, %c0_i32_0 : i32, i32
  }
  func.func @transform_4(%arg0: i32, %arg1: i32) -> (i32, i32) {
    %c0_i32 = arith.constant 0 : i32
    %c0_i32_0 = arith.constant 0 : i32
    %c0_i32_1 = arith.constant 0 : i32
    return %c0_i32, %c0_i32_0 : i32, i32
  }
  func.func @transform_5(%arg0: i32, %arg1: i32) -> (i32, i32) {
    %c0_i32 = arith.constant 0 : i32
    %c0_i32_0 = arith.constant 0 : i32
    %c0_i32_1 = arith.constant 0 : i32
    return %c0_i32, %c0_i32_0 : i32, i32
  }
  func.func @transform_6(%arg0: i32, %arg1: i32) -> (i32, i32) {
    %c0_i32 = arith.constant 0 : i32
    %c0_i32_0 = arith.constant 0 : i32
    %c0_i32_1 = arith.constant 0 : i32
    return %c0_i32, %c0_i32_0 : i32, i32
  }
  func.func @transform_7(%arg0: i32, %arg1: i32) -> (i32, i32) {
    %c0_i32 = arith.constant 0 : i32
    %c0_i32_0 = arith.constant 0 : i32
    %c0_i32_1 = arith.constant 0 : i32
    return %c0_i32, %c0_i32_0 : i32, i32
  }
  func.func @transform_8(%arg0: i32, %arg1: i32) -> (i32, i32) {
    %c0_i32 = arith.constant 0 : i32
    %c0_i32_0 = arith.constant 0 : i32
    %c0_i32_1 = arith.constant 0 : i32
    return %c0_i32, %c0_i32_0 : i32, i32
  }
  func.func @transform_9(%arg0: i32, %arg1: i32) -> (i32, i32) {
    %c0_i32 = arith.constant 0 : i32
    %c0_i32_0 = arith.constant 0 : i32
    %c0_i32_1 = arith.constant 0 : i32
    return %c0_i32, %c0_i32_0 : i32, i32
  }
  func.func @transform_10(%arg0: i32, %arg1: i32) -> (i32, i32) {
    %c0_i32 = arith.constant 0 : i32
    %c0_i32_0 = arith.constant 0 : i32
    %c0_i32_1 = arith.constant 0 : i32
    return %c0_i32, %c0_i32_0 : i32, i32
  }
  func.func @transform_11(%arg0: i32, %arg1: i32) -> (i32, i32) {
    %c0_i32 = arith.constant 0 : i32
    %c0_i32_0 = arith.constant 0 : i32
    %c0_i32_1 = arith.constant 0 : i32
    return %c0_i32, %c0_i32_0 : i32, i32
  }
  func.func @transform_12(%arg0: i32, %arg1: i32) -> (i32, i32, i32) {
    %c0_i32 = arith.constant 0 : i32
    %c0_i32_0 = arith.constant 0 : i32
    return %arg0, %arg1, %c0_i32 : i32, i32, i32
  }
  func.func @transform_13(%arg0: i32, %arg1: i32) -> (i32, i32, i32) {
    %c0_i32 = arith.constant 0 : i32
    %c0_i32_0 = arith.constant 0 : i32
    return %arg0, %arg1, %c0_i32 : i32, i32, i32
  }
}

</mosaic_0001>

<bundles_post_ra>
// kernel: tpu_custom_call.1
= control target key start
LH: loop header
LB: loop body
LE: loop exit
PB: predicated region body
PF: predicated region fallthrough
CT: control target
= control target key end

     0   :  { %s2642_s0 = inlined_call_operand.hbm [shape: f32[2,8,32], index: 0, kind: input, shape index: {}]   ;;  %s2643_s1 = inlined_call_operand.vmem [shape: f32[2,32,64], index: 1, kind: input, shape index: {}]   ;;  %s2644_s2 = inlined_call_operand.vmem [shape: s32[2,32,1], index: 2, kind: input, shape index: {}]   ;;  %s2645_s3 = inlined_call_operand.hbm [shape: f32[32,128], index: 3, kind: input, shape index: {}]   ;;  %s2646_s4 = inlined_call_operand.hbm [shape: f32[64,128], index: 4, kind: input, shape index: {}]   ;;  %s2647_s5 = inlined_call_operand.vmem [shape: f32[1,128], index: 5, kind: input, shape index: {}]   ;;  %s2648_s6 = inlined_call_operand.hbm [shape: f32[128,128], index: 6, kind: input, shape index: {}]   ;;  %s2649_s7 = inlined_call_operand.vmem [shape: f32[1,128], index: 7, kind: input, shape index: {}]   ;;  %s2650_s8 = inlined_call_operand.hbm [shape: f32[128,128], index: 8, kind: input, shape index: {}]   ;;  %s2651_s9 = inlined_call_operand.vmem [shape: f32[1,128], index: 9, kind: input, shape index: {}]   ;;  %s2652_s10 = inlined_call_operand.hbm [shape: f32[128,128], index: 10, kind: input, shape index: {}]   ;;  %s2653_s11 = inlined_call_operand.vmem [shape: f32[1,128], index: 11, kind: input, shape index: {}]   ;;  %s2654_s12 = inlined_call_operand.hbm [shape: f32[2,8,128], index: 12, kind: output, shape index: {0}]   ;;  %s2655_s13 = inlined_call_operand.hbm [shape: f32[2,32,128], index: 13, kind: output, shape index: {1}]  }
   0x1   :  { %2662 = sst [smem:[#allocation25_spill]] %s2642_s0 }
   0x2   :  { %2663 = sst [smem:[#allocation26_spill]] %s2643_s1 }
   0x3   :  { %2664 = sst [smem:[#allocation27_spill]] %s2645_s3 }
   0x4   :  { %2665 = sst [smem:[#allocation28_spill]] %s2646_s4 }
   0x5   :  { %2666 = sst [smem:[#allocation29_spill]] %s2648_s6 }
   0x6   :  { %2667 = sst [smem:[#allocation30_spill]] %s2650_s8 }
   0x7   :  { %2668 = sst [smem:[#allocation31_spill]] %s2652_s10 }
   0x8   :  { %2669 = sst [smem:[#allocation32_spill]] %s2653_s11 }
   0x9   :  { %2670 = sst [smem:[#allocation33_spill]] %s2654_s12 }
   0xa   :  { %2671 = sst [smem:[#allocation34_spill]] %s2655_s13 }
   0xb   :  { %19 = vsyncpa [#allocation4], 0 }
   0xc   :  { %21 = vsyncpa [#allocation4 + $0x1], 0 }
   0xd   :  { %22 = vsyncpa [#allocation7], 0 }
   0xe   :  { %23 = vsyncpa [#allocation10], 0 }
   0xf   :  { %24 = vsyncpa [#allocation13], 0 }
  0x10   :  { %25 = vsyncpa [#allocation5], 0 }
  0x11   :  { %27 = vsyncpa [#allocation5 + $0x1], 0 }
  0x12   :  { %28 = vsyncpa [#allocation16], 0 }
  0x13   :  { %30 = vsyncpa [#allocation16 + $0x1], 0  ;;  %s2291_s25 = smov 0   ;;  %s2293_s26 = smov 0  }
  0x14   :  { %s2295_s27 = smov 0   ;;  %s2297_s28 = smov 0  }
  0x15   :  { %s2299_s29 = smov 0   ;;  %s2301_s30 = smov 0  }
  0x16 LB: > { %2672 = sst [smem:[#allocation23_spill]] %s2200_s29  ;;  %s2656_s14 = sadd.s32 4294967295, %s2204_s30   ;;  %s2204_s30 = sphi %s2301_s30, %s36_s30   ;;  %s2200_s29 = sphi %s2299_s29, %s2698_s29   ;;  %s2196_s28 = sphi %s2297_s28, %s2697_s28   ;;  %s2192_s27 = sphi %s2295_s27, %s2701_s27   ;;  %s2188_s26 = sphi %s2293_s26, %s2700_s26   ;;  %s2184_s25 = sphi %s2291_s25, %s2699_s25  }
  0x17   : > { %p1513_p0 = scmp.ge.s32.totalorder %s2204_s30, 1  ;;  %p2325_p1 = scmp.eq.s32.totalorder %s2656_s14, 0 }
  0x18   : > { %p380_p2 = scmp.lt.s32.totalorder %s2204_s30, 3  ;;  %s2206_s17 = smov [#allocation6]  }
  0x19   : > { %s392_s18 = sshll.u32 %s2206_s17, 4  ;;  %s2207_s20 = smov [#allocation9]   ;;  %s393_s18 = int_to_ptr.vmem [resolvable:$true] %s392_s18 }
  0x1a   : > { %p2330_p3 = pnand %p1513_p0, %p380_p2  ;;  %s421_s21 = sshll.u32 %s2207_s20, 4  ;;  %s422_s21 = int_to_ptr.vmem [resolvable:$true] %s421_s21 }
  0x1b   : > { %s2208_s22 = smov [#allocation8]   ;;  %s1935_s17 = scalar_lea.vmem %s393_s18, 512 }
  0x1c   : > { %p1813_p4 = pneg %p2330_p3  ;;  %s405_s23 = sshll.u32 %s2208_s22, 4  ;;  %s406_s23 = int_to_ptr.vmem [resolvable:$true] %s405_s23 }
  0x1d   : > { %p1936_p8 = scmp.ne.s32.totalorder %s393_s18, %s1935_s17  ;;  %p1943_p11 = scmp.lt.s32.totalorder %s393_s18, %s393_s18 }
  0x1e   : > { %p2339_p6 = pnand %p1813_p4, %p2325_p1  ;;  %p1944_p12 = scmp.lt.s32.totalorder %s1935_s17, %s1935_s17 }
  0x20   : > { %p2345_p7 = pneg %p2339_p6  ;;  %p1945_p13 = por %p1944_p12, %p1943_p11 }
  0x22   : > { %p1938_p9 = pnand %p1936_p8, %p2345_p7 }
  0x24   : > { %p1939_p10 = pneg %p1938_p9 }
  0x26   : > { %p1946_p0 = pnand %p1945_p13, %p1939_p10 }
  0x28   : > { %1949 = shalt.err (!%p1946_p0)
}
  0x29   : > { %s2209_s20 = smov 128   ;;  %s2210_s22 = smov 8  }
  0x2a   : > { %s2677_s3 = sld [smem:[#allocation27_spill]]  ;;  %s1961_s11 = scalar_lea.vmem %s422_s21, 2048 }
  0x2b   : > { %p1962_p2 = scmp.ne.s32.totalorder %s422_s21, %s1961_s11  ;;  %p1969_p9 = scmp.lt.s32.totalorder %s422_s21, %s422_s21 }
  0x2c   : > { %p1970_p10 = scmp.lt.s32.totalorder %s1961_s11, %s1961_s11 }
  0x2d   : > { %p1964_p4 = pnand %p1962_p2, %p2345_p7 }
  0x2e   : > { %p1971_p11 = por %p1970_p10, %p1969_p9 }
  0x2f   : > { %p1965_p8 = pneg %p1964_p4 }
  0x30   : > { %1816 = dma.hbm_to_vmem [thread:$0]  (!%p2339_p6), %s2677_s3, 512, %s393_s18, [#allocation7], %s2209_s20, %s2209_s20, %s2210_s22  }
  0x31   : > { %p1972_p12 = pnand %p1971_p11, %p1965_p8 }
  0x33   : > { %1975 = shalt.err (!%p1972_p12)
}
  0x34   : > { %s2678_s6 = sld [smem:[#allocation29_spill]]  ;;  %s1987_s12 = scalar_lea.vmem %s406_s23, 1024 }
  0x35   : > { %p1988_p13 = scmp.ne.s32.totalorder %s406_s23, %s1987_s12  ;;  %p1995_p4 = scmp.lt.s32.totalorder %s406_s23, %s406_s23 }
  0x36   : > { %p1996_p9 = scmp.lt.s32.totalorder %s1987_s12, %s1987_s12 }
  0x37   : > { %p1990_p0 = pnand %p1988_p13, %p2345_p7 }
  0x38   : > { %p1997_p8 = por %p1996_p9, %p1995_p4 }
  0x39   : > { %p1991_p2 = pneg %p1990_p0 }
  0x3a   : > { %1822 = dma.hbm_to_vmem [thread:$0]  (!%p2339_p6), %s2678_s6, 2048, %s422_s21, [#allocation10], %s2209_s20, %s2209_s20, %s2210_s22  }
  0x3b   : > { %p1998_p10 = pnand %p1997_p8, %p1991_p2 }
  0x3d   : > { %2001 = shalt.err (!%p1998_p10)
}
  0x3e   : > { %s2679_s4 = sld [smem:[#allocation28_spill]]  ;;  %s2211_s14 = smov [#allocation11]  }
  0x3f   : > { %s437_s18 = sshll.u32 %s2211_s14, 4  ;;  %s2212_s21 = smov [#allocation12]   ;;  %s438_s18 = int_to_ptr.vmem [resolvable:$true] %s437_s18 }
  0x40   : > { %s453_s17 = sshll.u32 %s2212_s21, 4  ;;  %s2013_s3 = scalar_lea.vmem %s438_s18, 2048  ;;  %s454_s17 = int_to_ptr.vmem [resolvable:$true] %s453_s17 }
  0x41   : > { %p2014_p11 = scmp.ne.s32.totalorder %s438_s18, %s2013_s3  ;;  %p2021_p0 = scmp.lt.s32.totalorder %s438_s18, %s438_s18 }
  0x42   : > { %p2022_p2 = scmp.lt.s32.totalorder %s2013_s3, %s2013_s3 }
  0x43   : > { %p2016_p12 = pnand %p2014_p11, %p2345_p7 }
  0x44   : > { %1819 = dma.hbm_to_vmem [thread:$0]  (!%p2339_p6), %s2679_s4, 1024, %s406_s23, [#allocation7], %s2209_s20, %s2209_s20, %s2210_s22  }
  0x45   : > { %p2017_p13 = pneg %p2016_p12  ;;  %p2023_p4 = por %p2022_p2, %p2021_p0 }
  0x47   : > { %p2024_p9 = pnand %p2023_p4, %p2017_p13 }
  0x49   : > { %2027 = shalt.err (!%p2024_p9)
}
  0x4a   : > { %s2680_s8 = sld [smem:[#allocation30_spill]]  ;;  %s2039_s11 = scalar_lea.vmem %s454_s17, 2048 }
  0x4b   : > { %p2040_p8 = scmp.ne.s32.totalorder %s454_s17, %s2039_s11  ;;  %p2047_p12 = scmp.lt.s32.totalorder %s454_s17, %s454_s17 }
  0x4c   : > { %p2048_p0 = scmp.lt.s32.totalorder %s2039_s11, %s2039_s11 }
  0x4d   : > { %p2042_p10 = pnand %p2040_p8, %p2345_p7 }
  0x4e   : > { %p2049_p13 = por %p2048_p0, %p2047_p12 }
  0x4f   : > { %p2043_p11 = pneg %p2042_p10 }
  0x50   : > { %1825 = dma.hbm_to_vmem [thread:$0]  (!%p2339_p6), %s2680_s8, 2048, %s438_s18, [#allocation10], %s2209_s20, %s2209_s20, %s2210_s22  }
  0x51   : > { %p2050_p2 = pnand %p2049_p13, %p2043_p11 }
  0x53   : > { %2053 = shalt.err (!%p2050_p2)
}
  0x54   : > { %s2681_s10 = sld [smem:[#allocation31_spill]]  ;;  %s1512_s19 = sadd.s32 4294967294, %s2204_s30  }
  0x55   : > { %s48_s24 = sadd.s32 1, %s2200_s29  ;;  %s55_s14 = sadd.s32 1, %s2192_s27 }
  0x56   : > { %p50_p7 = scmp.ge.s32.totalorder %s48_s24, 2  ;;  %p62_p4 = scmp.ne.s32.totalorder %s2192_s27, %s2188_s26 }
  0x57   : > { %p63_p9 = scmp.eq.s32.totalorder %s2204_s30, 0  ;;  %p68_p8 = scmp.ne.s32.totalorder %s2188_s26, %s2184_s25 }
  0x58   : > { %s2703_s24 = smov (%p50_p7, %s48_s24), 0  ;;  %s2685_s21 = sadd.s32 4294967295, %s2204_s30  }
  0x59   : > { %2682 = sst [smem:[#allocation24_spill]] %s2703_s24  ;;  %p2409_p10 = por %p63_p9, %p62_p4 }
  0x5a   : > { %1828 = dma.hbm_to_vmem [thread:$0]  (!%p2339_p6), %s2681_s10, 2048, %s454_s17, [#allocation13], %s2209_s20, %s2209_s20, %s2210_s22  }
  0x5b   : > { %p2415_p6 = por %p2325_p1, %p68_p8  ;;  %s52_s22 = ssub.s32 %s2200_s29, %s2703_s24 }
  0x5c   : > { %p339_p11 = scmp.eq.s32.totalorder %s2685_s21, 1  ;;  %p53_p12 = scmp.eq.s32.totalorder %s52_s22, 0 }
  0x5d   : > { %p345_p0 = scmp.eq.s32.totalorder %s1512_s19, 1  ;;  %p1845_p2 = scmp.lt.s32.totalorder %s2204_s30, 2 }
  0x5e   : > { %p2423_p13 = por %p339_p11, %p62_p4  ;;  %s470_s11 = sand.u32 1, %s2192_s27  }
  0x5f   : > { %s2429_s23 = scalar_select %p53_p12, %s2192_s27, %s55_s14  }
  0x60   : > { %s2686_s17 = scalar_select %p2423_p13, 1, 0 }
  0x61   : > { %p2431_p7 = por %p345_p0, %p68_p8  ;;  %s1520_s3 = sshll.u32 %s470_s11, 3 }
  0x62   : > { %s1521_s13 = sshll.u32 %s2200_s29, 7  ;;  %s2688_s0 = sld [smem:[#allocation25_spill]] }
  0x63   : > { %s2687_s12 = scalar_select %p2431_p7, 1, 0 }
  0x64   : > { %s474_s22 = scalar_lea.vmem [#allocation3], %s1520_s3  ;;  %p2442_p4 = pnand %p1845_p2, %p2409_p10 }
  0x65   : > { %s481_s19 = sshll.u32 %s474_s22, 4  ;;  %s471_s14 = scalar_lea.sflag [#allocation4], %s470_s11  ;;  %s482_s19 = int_to_ptr.vmem [resolvable:$true] %s481_s19 }
  0x66   : > { %p2056_p9 = pneg %p2442_p4  ;;  %s2067_s10 = scalar_lea.vmem %s482_s19, 128 }
  0x67   : > { %p2068_p8 = scmp.ne.s32.totalorder %s482_s19, %s2067_s10  ;;  %s2213_s24 = smov [#allocation3]  }
  0x68   : > { %s479_s21 = scalar_lea.hbm %s2688_s0, %s1521_s13  ;;  %s2072_s29 = sshll.u32 %s2213_s24, 4  ;;  %s2073_s29 = int_to_ptr.vmem [resolvable:$false] %s2072_s29 }
  0x69   : > { %p2070_p11 = pnand %p2068_p8, %p2056_p9  ;;  %s2074_s4 = scalar_lea.vmem %s2073_s29, 256 }
  0x6a   : > { %p2075_p0 = scmp.lt.s32.totalorder %s482_s19, %s2073_s29  ;;  %p2076_p5 = scmp.lt.s32.totalorder %s2074_s4, %s2067_s10 }
  0x6b   : > { %p2071_p12 = pneg %p2070_p11 }
  0x6c   : > { %p2077_p7 = por %p2076_p5, %p2075_p0 }
  0x6e   : > { %p2078_p13 = pnand %p2077_p7, %p2071_p12 }
  0x70   : > { %2081 = shalt.err (!%p2078_p13)
}
  0x71   : > { %1832 = dma.hbm_to_vmem [thread:$0]  (!%p2442_p4), %s479_s21, 128, %s482_s19, %s471_s14  }
  0x72   : > { %516 = sbr.rel (%p2330_p3) target bundleno = 998 (0x3e6), region = 68  ;;  %s2453_s6 = sand.u32 (!%p2330_p3), 1, %s2188_s26  }
  0x73   : > { %s1523_s24 = sshll.u32 (!%p2330_p3), %s2453_s6, 3  ;;  %s519_s18 = scalar_lea.sflag (!%p2330_p3), [#allocation4], %s2453_s6 }
  0x74   : > { %s522_s10 = scalar_lea.vmem (!%p2330_p3), [#allocation3], %s1523_s24 }
  0x77   : > { %2159 = dma.done.wait (%p2415_p6), %s519_s18, 128  }
  0x78   : > { %2161 = vsyncadd (%p2415_p6), %s519_s18, 4294967168 }
  0x79   : > { %2163 = dma.done.wait (%p2325_p1), [#allocation7], 1536  }
  0x7a   : > { %2165 = vsyncadd (%p2325_p1), [#allocation7], 4294965760 }
  0x7b   : > { %2167 = dma.done.wait (%p2325_p1), [#allocation10], 4096  }
  0x7c   : > { %2169 = vsyncadd (%p2325_p1), [#allocation10], 4294963200 }
  0x7d   : > { %2171 = dma.done.wait (%p2325_p1), [#allocation13], 2048  }
  0x7e   : > { %2173 = vsyncadd (%p2325_p1), [#allocation13], 4294965248  ;;  %p609_p3 = scmp.lt.s32.totalorder %s2196_s28, 1  ;;  %v2214_v0 = vmov 0.0   ;;  %vm2215_vm0 = vmmov 0   ;;  %v2216_v1 = vmov 0   ;;  %v945_v39 = vlaneseq }
  0x7f   : > { %1638 = vmatprep.subr.mxu1 %v2214_v0  ;;  %1646 = vmatprep.mubr.msk.f32.mxu1 %vm2215_vm0, %v2214_v0  ;;  %v633_v2 = vld [vmem:[#allocation6 + $0x18] sm:$0xff]  ;;  %v632_v3 = vld [vmem:[#allocation6 + $0x10] sm:$0xff]  ;;  %v631_v4 = vld [vmem:[#allocation6 + $0x8] sm:$0xff]  ;;  %s2690_s1 = sld [smem:[#allocation26_spill]]  ;;  %vm634_vm1 = vcmask 261120   ;;  %vm727_vm2 = vcmask 523264  }
  0x80   : > { %1912 = vset.pattern.permute.xlu0 %v2216_v1  ;;  %1913 = vset.pattern.permute.xlu1 %v2216_v1  ;;  %s610_s8 = scalar_select %p609_p3, %s2196_s28, 1  ;;  %v630_v5 = vld [vmem:[#allocation6] sm:$0xff]  ;;  %v629_v6 = vld [vmem:[%s522_s10] sm:$0xff]  ;;  %v717_v14 = vld [vmem:[#allocation8 + $0x28] sm:$0xff]  ;;  %v946_v40 = vand.u32 127, %v945_v39  ;;  %vm971_vm3 = vcmask 64512  }
  0x81   : > { %1639 = vmatpush3.msra.mxu1 %v633_v2  ;;  %v719_v7 = vld [vmem:[#allocation8 + $0x38] sm:$0xff]  ;;  %v718_v11 = vld [vmem:[#allocation8 + $0x30] sm:$0xff]  ;;  %v716_v15 = vld [vmem:[#allocation8 + $0x20] sm:$0xff]  ;;  %s1530_s19 = sshll.u32 %s2453_s6, 5  ;;  %s1561_s15 = sshll.u32 %s2196_s28, 9 }
  0x82   : > { %s1559_s29 = sshll.u32 %s610_s8, 5  ;;  %1640 = vmatprep.subr.mxu1 %v2214_v0  ;;  %v715_v16 = vld [vmem:[#allocation8 + $0x18] sm:$0xff]  ;;  %v714_v17 = vld [vmem:[#allocation8 + $0x10] sm:$0xff]  ;;  %v713_v18 = vld [vmem:[#allocation8 + $0x8] sm:$0xff]  ;;  %s2542_s18 = scalar_lea.vmem [#allocation15], %s1530_s19 }
  0x83   : > { %s626_s20 = scalar_lea.vmem %s2644_s2, %s1559_s29  ;;  %1641 = vmatpush3.msra.mxu1 %v632_v3  ;;  %v712_v19 = vld [vmem:[#allocation8] sm:$0xff]  ;;  %v844_v23 = vld [vmem:[#allocation9 + $0x78] sm:$0xff]  ;;  %v843_v24 = vld [vmem:[#allocation9 + $0x70] sm:$0xff]  ;;  %s2691_s11 = sld [smem:[#allocation34_spill]] }
  0x84   : > { %1642 = vmatprep.subr.mxu1 %v2214_v0  ;;  %v941_v8 = vld [vmem:[%s626_s20] sm:$0xff]  ;;  %v943_v10 = vld [vmem:[%s626_s20 + $0x10] sm:$0xff]  ;;  %v942_v12 = vld [vmem:[%s626_s20 + $0x8] sm:$0xff]  ;;  %1671 = vmatprep.subr.mxu0 %v844_v23  ;;  %p2692_p5 = scmp.ne.s32.totalorder %s2686_s17, 0  ;;  %s2217_s22 = smov [#allocation15]  }
  0x85   : > { %s2487_s13 = scalar_lea.vmem %s2690_s1, %s1559_s29  ;;  %1643 = vmatpush3.msra.mxu1 %v631_v4  ;;  %948 = vperm.xlu0 %1912, %v941_v8   ;;  %v944_v13 = vld [vmem:[%s626_s20 + $0x18] sm:$0xff]  ;;  %v841_v26 = vld [vmem:[#allocation9 + $0x60] sm:$0xff]  ;;  %v840_v27 = vld [vmem:[#allocation9 + $0x58] sm:$0xff]  ;;  %s1310_s29 = sshll.u32 %s2542_s18, 4  ;;  %s2560_s29 = int_to_ptr.vmem [resolvable:$true] %s1310_s29 }
  0x86   : > { %1644 = vmatprep.subr.mxu1 %v2214_v0  ;;  %v708_v9 = vld [vmem:[%s2487_s13] sm:$0xff]  ;;  %954 = vperm.xlu1 %1913, %v943_v10   ;;  %v709_v20 = vld [vmem:[%s2487_s13 + $0x8] sm:$0xff]  ;;  %v710_v21 = vld [vmem:[%s2487_s13 + $0x10] sm:$0xff]  ;;  %s2082_s21 = scalar_lea.vmem %s2560_s29, 512  ;;  %s2086_s19 = sshll.u32 %s2217_s22, 4  ;;  %s2087_s19 = int_to_ptr.vmem [resolvable:$false] %s2086_s19 }
  0x87   : > { %1645 = vmatpush3.msra.mxu1 %v630_v5  ;;  %v711_v22 = vld [vmem:[%s2487_s13 + $0x18] sm:$0xff]  ;;  %1672 = vmatpush3.msra.mxu0 %v844_v23  ;;  %v839_v28 = vld [vmem:[#allocation9 + $0x50] sm:$0xff]  ;;  %v837_v30 = vld [vmem:[#allocation9 + $0x40] sm:$0xff]  ;;  %s1281_s13 = scalar_lea.sflag [#allocation16], %s2453_s6  ;;  %p2083_p1 = scmp.ne.s32.totalorder %s2560_s29, %s2082_s21 }
  0x88   : > { %1647 = vmatmul.mubr.msk.f32.vlgmr.msra.gmra.mxu1 %vm634_vm1, %v629_v6  ;;  %1649 = vmatprep.subr.mxu1 %v719_v7  ;;  %v842_v25 = vld [vmem:[#allocation9 + $0x68] sm:$0xff]  ;;  %v836_v31 = vld [vmem:[#allocation9 + $0x38] sm:$0xff]  ;;  %v835_v32 = vld [vmem:[#allocation9 + $0x30] sm:$0xff]  ;;  %s2088_s14 = scalar_lea.vmem %s2087_s19, 1024  ;;  %p2089_p13 = scmp.lt.s32.totalorder %s2560_s29, %s2087_s19 }
  0x89   : > { %1650 = vmatpush3.msra.mxu1 %v719_v7  ;;  %1665 = vmatprep.mubr.msk.f32.mxu1 %vm727_vm2, %v708_v9  ;;  %v838_v29 = vld [vmem:[#allocation9 + $0x48] sm:$0xff]  ;;  %v833_v34 = vld [vmem:[#allocation9 + $0x20] sm:$0xff]  ;;  %v832_v35 = vld [vmem:[#allocation9 + $0x18] sm:$0xff]  ;;  %s2566_s3 = scalar_lea.hbm %s2691_s11, %s1561_s15  ;;  %p2084_p10 = pnand %p2083_p1, %p2692_p5 }
  0x8a   : > { %1651 = vmatprep.subr.mxu1 %v718_v11  ;;  %951 = vperm.xlu0 %1912, %v942_v12   ;;  %v834_v33 = vld [vmem:[#allocation9 + $0x28] sm:$0xff]  ;;  %v831_v36 = vld [vmem:[#allocation9 + $0x10] sm:$0xff]  ;;  %v829_v38 = vld [vmem:[#allocation9] sm:$0xff]  ;;  %p2090_p2 = scmp.lt.s32.totalorder %s2088_s14, %s2082_s21 }
  0x8b   : > { %1652 = vmatpush3.msra.mxu1 %v718_v11  ;;  %957 = vperm.xlu1 %1913, %v944_v13   ;;  %v830_v37 = vld [vmem:[#allocation9 + $0x8] sm:$0xff]  ;;  %v1102_v49 = vld [vmem:[#allocation11 + $0x78] sm:$0xff]  ;;  %v1536_v52 = vld [vmem:[%s2647_s5] ss:$0 sm:$0xff]  ;;  %p2085_p6 = pneg %p2084_p10 }
  0x8c   : > { %1653 = vmatprep.subr.mxu1 %v717_v14  ;;  %1673 = vmatprep.subr.mxu0 %v843_v24  ;;  %v1101_v2 = vld [vmem:[#allocation11 + $0x70] sm:$0xff]  ;;  %v1100_v3 = vld [vmem:[#allocation11 + $0x68] sm:$0xff]  ;;  %v1099_v4 = vld [vmem:[#allocation11 + $0x60] sm:$0xff]  ;;  %p2091_p7 = por %p2090_p2, %p2089_p13 }
  0x8d   : > { %1654 = vmatpush3.msra.mxu1 %v717_v14  ;;  %1674 = vmatpush3.msra.mxu0 %v843_v24  ;;  %v1098_v5 = vld [vmem:[#allocation11 + $0x58] sm:$0xff]  ;;  %v1097_v6 = vld [vmem:[#allocation11 + $0x50] sm:$0xff]  ;;  %v1096_v7 = vld [vmem:[#allocation11 + $0x48] sm:$0xff] }
  0x8e   : > { %1655 = vmatprep.subr.mxu1 %v716_v15  ;;  %1675 = vmatprep.subr.mxu0 %v842_v25  ;;  %v1095_v8 = vld [vmem:[#allocation11 + $0x40] sm:$0xff]  ;;  %v1094_v9 = vld [vmem:[#allocation11 + $0x38] sm:$0xff]  ;;  %v1093_v10 = vld [vmem:[#allocation11 + $0x30] sm:$0xff]  ;;  %p2092_p4 = pnand %p2091_p7, %p2085_p6 }
  0x8f   : > { %1656 = vmatpush3.msra.mxu1 %v716_v15  ;;  %1676 = vmatpush3.msra.mxu0 %v842_v25  ;;  %v1092_v11 = vld [vmem:[#allocation11 + $0x28] sm:$0xff]  ;;  %v1091_v12 = vld [vmem:[#allocation11 + $0x20] sm:$0xff]  ;;  %v1090_v13 = vld [vmem:[#allocation11 + $0x18] sm:$0xff] }
  0x90   : > { %1657 = vmatprep.subr.mxu1 %v715_v16  ;;  %1677 = vmatprep.subr.mxu0 %v841_v26  ;;  %v1089_v14 = vld [vmem:[#allocation11 + $0x10] sm:$0xff]  ;;  %v1088_v15 = vld [vmem:[#allocation11 + $0x8] sm:$0xff] }
  0x91   : > { %1658 = vmatpush3.msra.mxu1 %v715_v16  ;;  %1678 = vmatpush3.msra.mxu0 %v841_v26  ;;  %v1087_v16 = vld [vmem:[#allocation11] sm:$0xff]  ;;  %v1190_v23 = vld [vmem:[#allocation12 + $0x48] sm:$0xff]  ;;  %v1541_v25 = vld [vmem:[%s2649_s7] ss:$0 sm:$0xff] }
  0x92   : > { %1659 = vmatprep.subr.mxu1 %v714_v17  ;;  %1679 = vmatprep.subr.mxu0 %v840_v27 }
  0x93   : > { %1660 = vmatpush3.msra.mxu1 %v714_v17  ;;  %1680 = vmatpush3.msra.mxu0 %v840_v27  ;;  %v1196_v17 = vld [vmem:[#allocation12 + $0x78] sm:$0xff] }
  0x94   : > { %1661 = vmatprep.subr.mxu1 %v713_v18  ;;  %1681 = vmatprep.subr.mxu0 %v839_v28 }
  0x95   : > { %1662 = vmatpush3.msra.mxu1 %v713_v18  ;;  %1682 = vmatpush3.msra.mxu0 %v839_v28  ;;  %v1195_v18 = vld [vmem:[#allocation12 + $0x70] sm:$0xff] }
  0x96   : > { %1663 = vmatprep.subr.mxu1 %v712_v19  ;;  %1683 = vmatprep.subr.mxu0 %v838_v29 }
  0x97   : > { %1664 = vmatpush3.msra.mxu1 %v712_v19  ;;  %1684 = vmatpush3.msra.mxu0 %v838_v29  ;;  %v1194_v19 = vld [vmem:[#allocation12 + $0x68] sm:$0xff] }
  0x98   : > { %1666 = vmatmul.mubr.msk.f32.vlgmr.msra.gmra.mxu1 %vm727_vm2, %v709_v20  ;;  %1685 = vmatprep.subr.mxu0 %v837_v30  ;;  %v1193_v20 = vld [vmem:[#allocation12 + $0x60] sm:$0xff] }
  0x99   : > { %1668 = vmatprep.mubr.msk.f32.mxu1 %vm727_vm2, %v710_v21  ;;  %1686 = vmatpush3.msra.mxu0 %v837_v30  ;;  %v1192_v21 = vld [vmem:[#allocation12 + $0x58] sm:$0xff] }
  0x9a   : > { %1687 = vmatprep.subr.mxu0 %v836_v31 }
  0x9b   : > { %1688 = vmatpush3.msra.mxu0 %v836_v31 }
  0x9c   : > { %1669 = vmatmul.mubr.msk.f32.gmra.mxu1 %vm727_vm2, %v711_v22  ;;  %1689 = vmatprep.subr.mxu0 %v835_v32  ;;  %v1191_v22 = vld [vmem:[#allocation12 + $0x50] sm:$0xff] }
  0x9d   : > { %1690 = vmatpush3.msra.mxu0 %v835_v32 }
  0x9e   : > { %1691 = vmatprep.subr.mxu0 %v834_v33 }
  0x9f   : > { %1692 = vmatpush3.msra.mxu0 %v834_v33 }
  0xa0   : > { %1693 = vmatprep.subr.mxu0 %v833_v34 }
  0xa1   : > { %1694 = vmatpush3.msra.mxu0 %v833_v34 }
  0xa2   : > { %1695 = vmatprep.subr.mxu0 %v832_v35 }
  0xa3   : > { %1696 = vmatpush3.msra.mxu0 %v832_v35 }
  0xa4   : > { %1697 = vmatprep.subr.mxu0 %v831_v36 }
  0xa5   : > { %1698 = vmatpush3.msra.mxu0 %v831_v36 }
  0xa6   : > { %1699 = vmatprep.subr.mxu0 %v830_v37 }
  0xa7   : > { %1700 = vmatpush3.msra.mxu0 %v830_v37 }
  0xa8   : > { %1701 = vmatprep.subr.mxu0 %v829_v38 }
  0xa9   : > { %1702 = vmatpush3.msra.mxu0 %v829_v38 }
  0xaa   : > { %1752 = vmatprep.subr.mxu0 %v2214_v0 }
 0x100   : > { %v949_v41 = vpop.permute.xlu0 %948 }
 0x101   : > { %vm959_vm4 = vcmp.eq.s32.totalorder %v949_v41, %v946_v40  ;;  %v955_v43 = vpop.permute.xlu1 %954 }
 0x102   : > { %v1542_v42 = vsel %vm959_vm4, 1.0, %v2214_v0  ;;  %vm961_vm6 = vcmp.eq.s32.totalorder %v955_v43, %v946_v40 }
 0x103   : > { %1711 = vmatprep.mubr.msk.f32.mxu1 %vm971_vm3, %v1542_v42  ;;  %v1544_v48 = vsel %vm961_vm6, 1.0, %v2214_v0 }
 0x105   : > { %v952_v44 = vpop.permute.xlu0 %951 }
 0x106   : > { %vm960_vm5 = vcmp.eq.s32.totalorder %v952_v44, %v946_v40  ;;  %v958_v45 = vpop.permute.xlu1 %957 }
 0x107   : > { %v1543_v47 = vsel %vm960_vm5, 1.0, %v2214_v0  ;;  %vm962_vm7 = vcmp.eq.s32.totalorder %v958_v45, %v946_v40 }
 0x108   : > { %v1545_v51 = vsel %vm962_vm7, 1.0, %v2214_v0 }
 0x148   : > { %v704_v46 = vpop.f32.mrf.mxu1 }
 0x149   : > { %1709 = vmatprep.subr.mxu1 %v704_v46 }
 0x14a   : > { %v1648_v50 = vpop.f32.mrf.mxu1  ;;  %1710 = vmatpush3.msra.mxu1 %v704_v46 }
 0x14b   : > { %1712 = vmatmul.mubr.msk.f32.vlgmr.msra.gmra.mxu1 %vm971_vm3, %v1543_v47  ;;  %1717 = vmatprep.subr.mxu1 %v2214_v0  ;;  %v1187_v50 = vld [vmem:[#allocation12 + $0x30] sm:$0xff] }
 0x14c   : > { %1714 = vmatprep.mubr.msk.f32.mxu1 %vm971_vm3, %v1544_v48  ;;  %1718 = vmatpush3.msra.mxu1 %v1102_v49  ;;  %v1189_v48 = vld [vmem:[#allocation12 + $0x40] sm:$0xff]  ;;  %v1188_v49 = vld [vmem:[#allocation12 + $0x38] sm:$0xff] }
 0x14d   : > { %1719 = vmatprep.subr.mxu1 %v2214_v0 }
 0x14e   : > { %1720 = vmatpush3.msra.mxu1 %v1101_v2 }
 0x14f   : > { %1715 = vmatmul.mubr.msk.f32.gmra.mxu1 %vm971_vm3, %v1545_v51  ;;  %1721 = vmatprep.subr.mxu1 %v2214_v0  ;;  %v1186_v51 = vld [vmem:[#allocation12 + $0x28] sm:$0xff] }
 0x150   : > { %1749 = vmatprep.mubr.msk.f32.mxu1 %vm2215_vm0, %v2214_v0  ;;  %1722 = vmatpush3.msra.mxu1 %v1100_v3 }
 0x151   : > { %1723 = vmatprep.subr.mxu1 %v2214_v0 }
 0x152   : > { %1724 = vmatpush3.msra.mxu1 %v1099_v4 }
 0x153   : > { %1725 = vmatprep.subr.mxu1 %v2214_v0 }
 0x154   : > { %1726 = vmatpush3.msra.mxu1 %v1098_v5 }
 0x155   : > { %1727 = vmatprep.subr.mxu1 %v2214_v0 }
 0x156   : > { %1728 = vmatpush3.msra.mxu1 %v1097_v6 }
 0x157   : > { %1729 = vmatprep.subr.mxu1 %v2214_v0 }
 0x158   : > { %v1667_v53 = vpop.f32.mrf.mxu1  ;;  %1730 = vmatpush3.msra.mxu1 %v1096_v7 }
 0x159   : > { %v812_v54 = vadd.f32 %v1667_v53, %v1536_v52  ;;  %1731 = vmatprep.subr.mxu1 %v2214_v0  ;;  %v1184_v53 = vld [vmem:[#allocation12 + $0x18] sm:$0xff] }
 0x15a   : > { %v806_v55 = vpop.f32.mrf.mxu1  ;;  %1732 = vmatpush3.msra.mxu1 %v1095_v8 }
 0x15b   : > { %v807_v56 = vadd.f32 %v1536_v52, %v806_v55  ;;  %1733 = vmatprep.subr.mxu1 %v2214_v0  ;;  %v1182_v55 = vld [vmem:[#allocation12 + $0x8] sm:$0xff] }
 0x15c   : > { %v1670_v57 = vpop.f32.mrf.mxu1  ;;  %1734 = vmatpush3.msra.mxu1 %v1094_v9 }
 0x15d   : > { %1914 = vtanh.f32 %v807_v56  ;;  %v822_v58 = vadd.f32 %v1670_v57, %v1536_v52  ;;  %1735 = vmatprep.subr.mxu1 %v2214_v0  ;;  %v1181_v56 = vld [vmem:[#allocation12] sm:$0xff]  ;;  %v1550_v57 = vld [vmem:[%s2651_s9] ss:$0 sm:$0xff] }
 0x15e   : > { %1916 = vtanh.f32 %v812_v54  ;;  %v816_v59 = vpop.f32.mrf.mxu1  ;;  %1736 = vmatpush3.msra.mxu1 %v1093_v10  ;;  %v1183_v54 = vld [vmem:[#allocation12 + $0x10] sm:$0xff] }
 0x15f   : > { %v817_v60 = vadd.f32 %v1536_v52, %v816_v59  ;;  %1737 = vmatprep.subr.mxu1 %v2214_v0  ;;  %v1185_v52 = vld [vmem:[#allocation12 + $0x20] sm:$0xff] }
 0x160   : > { %1738 = vmatpush3.msra.mxu1 %v1092_v11 }
 0x161   : > { %1918 = vtanh.f32 %v817_v60  ;;  %1739 = vmatprep.subr.mxu1 %v2214_v0 }
 0x162   : > { %1920 = vtanh.f32 %v822_v58  ;;  %1740 = vmatpush3.msra.mxu1 %v1091_v12 }
 0x163   : > { %1741 = vmatprep.subr.mxu1 %v2214_v0 }
 0x164   : > { %1742 = vmatpush3.msra.mxu1 %v1090_v13 }
 0x165   : > { %1743 = vmatprep.subr.mxu1 %v2214_v0 }
 0x166   : > { %1744 = vmatpush3.msra.mxu1 %v1089_v14 }
 0x167   : > { %1745 = vmatprep.subr.mxu1 %v2214_v0 }
 0x168   : > { %1746 = vmatpush3.msra.mxu1 %v1088_v15 }
 0x169   : > { %1747 = vmatprep.subr.mxu1 %v2214_v0 }
 0x16a   : > { %v1915_v61 = vpop.eup %1914  ;;  %1748 = vmatpush3.msra.mxu1 %v1087_v16 }
 0x16b   : > { %v1917_v62 = vpop.eup %1916  ;;  %1703 = vmatprep.mubr.f32.mxu0 %v1915_v61 }
 0x16c   : > { %1704 = vmatmul.mubr.f32.vlgmr.msra.gmra.mxu0 %v1917_v62 }
 0x16d   : > { %1753 = vmatpush3.msra.mxu0 %v1196_v17 }
 0x16e   : > { %v1919_v63 = vpop.eup %1918  ;;  %1754 = vmatprep.subr.mxu0 %v2214_v0 }
 0x16f   : > { %v1921_v1 = vpop.eup %1920  ;;  %1706 = vmatprep.mubr.f32.mxu0 %v1919_v63  ;;  %1755 = vmatpush3.msra.mxu0 %v1195_v18 }
 0x170   : > { %1707 = vmatmul.mubr.f32.gmra.mxu0 %v1921_v1  ;;  %1756 = vmatprep.subr.mxu0 %v2214_v0 }
 0x171   : > { %1784 = vmatprep.mubr.msk.f32.mxu0 %vm2215_vm0, %v2214_v0  ;;  %1757 = vmatpush3.msra.mxu0 %v1194_v19 }
 0x172   : > { %1758 = vmatprep.subr.mxu0 %v2214_v0 }
 0x173   : > { %1759 = vmatpush3.msra.mxu0 %v1193_v20 }
 0x174   : > { %1760 = vmatprep.subr.mxu0 %v2214_v0 }
 0x175   : > { %1761 = vmatpush3.msra.mxu0 %v1192_v21 }
 0x176   : > { %1762 = vmatprep.subr.mxu0 %v2214_v0 }
 0x177   : > { %1763 = vmatpush3.msra.mxu0 %v1191_v22 }
 0x178   : > { %1764 = vmatprep.subr.mxu0 %v2214_v0 }
 0x179   : > { %1765 = vmatpush3.msra.mxu0 %v1190_v23 }
 0x17a   : > { %1766 = vmatprep.subr.mxu0 %v2214_v0 }
 0x17b   : > { %1767 = vmatpush3.msra.mxu0 %v1189_v48 }
 0x17c   : > { %1768 = vmatprep.subr.mxu0 %v2214_v0 }
 0x17d   : > { %1769 = vmatpush3.msra.mxu0 %v1188_v49 }
 0x17e   : > { %1770 = vmatprep.subr.mxu0 %v2214_v0 }
 0x17f   : > { %1771 = vmatpush3.msra.mxu0 %v1187_v50 }
 0x180   : > { %1772 = vmatprep.subr.mxu0 %v2214_v0 }
 0x181   : > { %1773 = vmatpush3.msra.mxu0 %v1186_v51 }
 0x182   : > { %1774 = vmatprep.subr.mxu0 %v2214_v0 }
 0x183   : > { %1775 = vmatpush3.msra.mxu0 %v1185_v52 }
 0x184   : > { %1776 = vmatprep.subr.mxu0 %v2214_v0 }
 0x185   : > { %1777 = vmatpush3.msra.mxu0 %v1184_v53 }
 0x186   : > { %1778 = vmatprep.subr.mxu0 %v2214_v0 }
 0x187   : > { %1779 = vmatpush3.msra.mxu0 %v1183_v54 }
 0x188   : > { %1780 = vmatprep.subr.mxu0 %v2214_v0 }
 0x189   : > { %1781 = vmatpush3.msra.mxu0 %v1182_v55 }
 0x18a   : > { %1782 = vmatprep.subr.mxu0 %v2214_v0 }
 0x18b   : > { %1783 = vmatpush3.msra.mxu0 %v1181_v56 }
 0x20b   : > { %v1713_v24 = vpop.f32.mrf.mxu1 }
 0x20d   : > { %v1050_v26 = vpop.f32.mrf.mxu1 }
 0x20f   : > { %v1716_v32 = vpop.f32.mrf.mxu1 }
 0x211   : > { %v1060_v39 = vpop.f32.mrf.mxu1 }
 0x22c   : > { %v1705_v27 = vpop.f32.mrf.mxu0 }
 0x22d   : > { %v924_v28 = vadd.f32 %v1705_v27, %v1541_v25 }
 0x22e   : > { %v918_v29 = vpop.f32.mrf.mxu0 }
 0x22f   : > { %938 = vst [vmem:[%s2542_s18 + $0x8] sm:$0xff] %v924_v28  ;;  %v1070_v30 = vmul.f32 %v1713_v24, %v924_v28  ;;  %v919_v31 = vadd.f32 %v1541_v25, %v918_v29 }
 0x230   : > { %v1708_v33 = vpop.f32.mrf.mxu0 }
 0x231   : > { %1074 = vst [vmem:[#allocation2 + $0x8] sm:$0xff] %v1070_v30  ;;  %937 = vst [vmem:[%s2542_s18] sm:$0xff] %v919_v31  ;;  %v1069_v34 = vmul.f32 %v1050_v26, %v919_v31  ;;  %v934_v35 = vadd.f32 %v1708_v33, %v1541_v25 }
 0x232   : > { %v928_v36 = vpop.f32.mrf.mxu0 }
 0x233   : > { %1073 = vst [vmem:[#allocation2] sm:$0xff] %v1069_v34  ;;  %940 = vst [vmem:[%s2542_s18 + $0x18] sm:$0xff] %v934_v35  ;;  %v1072_v37 = vmul.f32 %v1716_v32, %v934_v35  ;;  %v929_v38 = vadd.f32 %v1541_v25, %v928_v36 }
 0x235   : > { %1076 = vst [vmem:[#allocation2 + $0x18] sm:$0xff] %v1072_v37  ;;  %939 = vst [vmem:[%s2542_s18 + $0x10] sm:$0xff] %v929_v38  ;;  %v1071_v40 = vmul.f32 %v1060_v39, %v929_v38 }
 0x237   : > { %1075 = vst [vmem:[#allocation2 + $0x10] sm:$0xff] %v1071_v40 }
 0x23e   : > { %v1077_v41 = vld [vmem:[#allocation2] ss:$4 sm:$0xff]  ;;  %v1079_v42 = vld [vmem:[#allocation2 + $0x1] ss:$4 sm:$0xff]  ;;  %v1082_v44 = vld [vmem:[#allocation2 + $0x2] ss:$4 sm:$0xff] }
 0x23f   : > { %v1080_v43 = vadd.f32 %v1079_v42, %v1077_v41  ;;  %v1085_v46 = vld [vmem:[#allocation2 + $0x3] ss:$4 sm:$0xff] }
 0x241   : > { %v1083_v45 = vadd.f32 %v1082_v44, %v1080_v43 }
 0x243   : > { %v1086_v47 = vadd.f32 %v1085_v46, %v1083_v45 }
 0x245   : > { %1750 = vmatmul.mubr.f32.vlgmr.msra.gmra.mxu1 %v1086_v47 }
 0x305   : > { %v1176_v58 = vpop.f32.mrf.mxu1 }
 0x306   : > { %v1177_v59 = vadd.f32 %v1550_v57, %v1176_v58 }
 0x307   : > { %v1751_v60 = vpop.f32.mrf.mxu1 }
 0x308   : > { %1922 = vtanh.f32 %v1177_v59 }
 0x315   : > { %v1923_v61 = vpop.eup %1922 }
 0x316   : > { %1785 = vmatmul.mubr.f32.vlgmr.msra.gmra.mxu0 %v1923_v61 }
 0x317   : > { %2095 = shalt.err (!%p2092_p4)
}
 0x318   : > { %s2096_s4 = scalar_lea.hbm %s2566_s3, 512  ;;  %s2100_s8 = scalar_lea.hbm %s2691_s11, 1024 }
 0x319   : > { %p2097_p9 = scmp.ne.s32.totalorder %s2566_s3, %s2096_s4  ;;  %p2101_p12 = scmp.lt.s32.totalorder %s2566_s3, %s2691_s11 }
 0x31a   : > { %p2102_p0 = scmp.lt.s32.totalorder %s2100_s8, %s2096_s4 }
 0x31b   : > { %p2098_p8 = pnand %p2097_p9, %p2692_p5 }
 0x31c   : > { %p2103_p3 = por %p2102_p0, %p2101_p12 }
 0x31d   : > { %p2099_p11 = pneg %p2098_p8 }
 0x31f   : > { %p2104_p1 = pnand %p2103_p3, %p2099_p11 }
 0x321   : > { %2107 = shalt.err (!%p2104_p1)
}
 0x322   : > { %s2218_s20 = smov 128   ;;  %s2219_s21 = smov 8  }
 0x323   : > { %1810 = dma.vmem_to_hbm [thread:$0]  (%p2692_p5), %s2560_s29, 512, %s2566_s3, %s1281_s13, %s2218_s20, %s2218_s20, %s2219_s21  }
 0x324   : > { %s2693_s14 = sld [smem:[#allocation32_spill]]  ;;  %s1554_s4 = sshll.u32 %s2196_s28, 7 }
 0x325   : > { %s600_s18 = scalar_lea.vmem [#allocation14], %s1523_s24  ;;  %s2694_s16 = sld [smem:[#allocation33_spill]] }
 0x326   : > { %s1295_s10 = sshll.u32 %s600_s18, 4  ;;  %s1276_s1 = scalar_lea.sflag [#allocation5], %s2453_s6  ;;  %s1296_s10 = int_to_ptr.vmem [resolvable:$true] %s1295_s10 }
 0x327   : > { %s2108_s29 = scalar_lea.vmem %s1296_s10, 128  ;;  %s2220_s28 = smov [#allocation14]  }
 0x328   : > { %p2109_p10 = scmp.ne.s32.totalorder %s1296_s10, %s2108_s29  ;;  %s2112_s3 = sshll.u32 %s2220_s28, 4  ;;  %s2113_s3 = int_to_ptr.vmem [resolvable:$false] %s2112_s3 }
 0x329   : > { %s2114_s24 = scalar_lea.vmem %s2113_s3, 256  ;;  %p2115_p2 = scmp.lt.s32.totalorder %s1296_s10, %s2113_s3 }
 0x32a   : > { %v1551_v0 = vld [vmem:[%s2693_s14] ss:$0 sm:$0xff]  ;;  %p2110_p6 = pnand %p2109_p10, %p2692_p5  ;;  %p2116_p7 = scmp.lt.s32.totalorder %s2114_s24, %s2108_s29 }
 0x32b   : > { %s2600_s0 = scalar_lea.hbm %s2694_s16, %s1554_s4 }
 0x32c   : > { %p2111_p13 = pneg %p2110_p6  ;;  %p2117_p4 = por %p2116_p7, %p2115_p2 }
 0x32e   : > { %p2118_p9 = pnand %p2117_p4, %p2111_p13 }
 0x3d6   : > { %v1270_v62 = vpop.f32.mrf.mxu0 }
 0x3d7   : > { %v1271_v63 = vadd.f32 %v1551_v0, %v1270_v62 }
 0x3d8   : > { %v1786_v1 = vpop.f32.mrf.mxu0 }
 0x3d9   : > { %1274 = vst [vmem:[%s600_s18] sm:$0xff] %v1271_v63 }
 0x3da   : > { %2121 = shalt.err (!%p2118_p9)
}
 0x3db   : > { %s2122_s13 = scalar_lea.hbm %s2600_s0, 128  ;;  %s2126_s21 = scalar_lea.hbm %s2694_s16, 256 }
 0x3dc   : > { %p2123_p8 = scmp.ne.s32.totalorder %s2600_s0, %s2122_s13  ;;  %p2127_p0 = scmp.lt.s32.totalorder %s2600_s0, %s2694_s16 }
 0x3dd   : > { %p2128_p3 = scmp.lt.s32.totalorder %s2126_s21, %s2122_s13 }
 0x3de   : > { %p2124_p11 = pnand %p2123_p8, %p2692_p5 }
 0x3df   : > { %p2129_p1 = por %p2128_p3, %p2127_p0 }
 0x3e0   : > { %p2125_p12 = pneg %p2124_p11 }
 0x3e2   : > { %p2130_p10 = pnand %p2129_p1, %p2125_p12 }
 0x3e4   : > { %2133 = shalt.err (!%p2130_p10)
}
 0x3e5   : > { %1809 = dma.vmem_to_hbm [thread:$0]  (%p2692_p5), %s1296_s10, 128, %s2600_s0, %s1276_s1  }
 0x3e6 PF: > { %s1325_s14 = sand.u32 1, %s2184_s25   ;;  %p2695_p6 = scmp.ne.s32.totalorder %s2687_s12, 0 }
 0x3e7   : > { %p2696_p13 = scmp.ge.s32.totalorder %s2204_s30, 2  ;;  %s1326_s4 = scalar_lea.sflag [#allocation5], %s1325_s14 }
 0x3e9   : > { %p1834_p2 = pnand %p2696_p13, %p2695_p6 }
 0x3eb   : > { %p1835_p7 = pneg %p1834_p2 }
 0x3ed   : > { %2175 = dma.done.wait (%p1835_p7), %s1326_s4, 128  }
 0x3ee   : > { %2177 = vsyncadd (%p1835_p7), %s1326_s4, 4294967168  ;;  %s1335_s18 = scalar_lea.sflag [#allocation16], %s1325_s14 }
 0x3ef   : > { %2179 = dma.done.wait (%p1835_p7), %s1335_s18, 512  }
 0x3f0   : > { %2181 = vsyncadd (%p1835_p7), %s1335_s18, 4294966784  ;;  %s36_s30 = sadd.s32 1, %s2204_s30   ;;  %s2697_s28 = sld [smem:[#allocation23_spill]] }
 0x3f1   : > { %p33_p4 = scmp.ge.s32.totalorder %s36_s30, 4   ;;  %s2698_s29 = sld [smem:[#allocation24_spill]] }
 0x3f2   : > { %s2699_s25 = smov %s2188_s26  ;;  %s2700_s26 = smov %s2192_s27 }
 0x3f3   : > { %s2701_s27 = smov %s2429_s23  ;;  %35 = sbr.rel (!%p33_p4) target bundleno = 22 (0x16), region = 159 }
 0x3f8   :  { %1340 = vsyncpa [#allocation4], 1 }
 0x3f9   :  { %1342 = vsyncpa [#allocation4 + $0x1], 1 }
 0x3fa   :  { %1343 = vsyncpa [#allocation7], 1 }
 0x3fb   :  { %1344 = vsyncpa [#allocation10], 1 }
 0x3fc   :  { %1345 = vsyncpa [#allocation13], 1 }
 0x3fd   :  { %1346 = vsyncpa [#allocation5], 1 }
 0x3fe   :  { %1348 = vsyncpa [#allocation5 + $0x1], 1 }
 0x3ff   :  { %1349 = vsyncpa [#allocation16], 1 }
 0x400   :  { %1351 = vsyncpa [#allocation16 + $0x1], 1 }

</bundles_post_ra>
